<compile_context>
chip_gen: v6e
topology: v6e:2x2x1
jax: 0.10.0
libtpu: 0.0.40
codegen_flags: <defaults>
</compile_context>

<pallas_src>
import jax
import jax.numpy as jnp
from jax.experimental import pallas as pl
from jax.experimental.pallas import tpu as pltpu


def _gru_cell_kernel(x_ref, h_ref, wih_ref, whh_ref, bih_ref, bhh_ref, o_ref):
    # x_ref:   (TB, F)      h_ref:   (TB, H)
    # wih_ref: (F, 3H)      whh_ref: (H, 3H)   (pre-transposed W^T)
    # bih_ref: (1, 3H)      bhh_ref: (1, 3H)
    # o_ref:   (TB, H)
    H = o_ref.shape[-1]

    x = x_ref[...]
    h = h_ref[...].astype(jnp.float32)

    gi = jnp.dot(x, wih_ref[...], preferred_element_type=jnp.float32) + bih_ref[...]
    gh = jnp.dot(h, whh_ref[...], preferred_element_type=jnp.float32) + bhh_ref[...]

    def _sigmoid(v):
        return 1.0 / (1.0 + jnp.exp(-v))

    r = _sigmoid(gi[:, 0:H] + gh[:, 0:H])
    z = _sigmoid(gi[:, H:2 * H] + gh[:, H:2 * H])
    n = jnp.tanh(gi[:, 2 * H:3 * H] + r * gh[:, 2 * H:3 * H])

    h_new = (1.0 - z) * n + z * h
    o_ref[...] = (h_new / 10.0).astype(o_ref.dtype)


def gru_net_forward(inp, t, dt, hidden, params, *, tb_max=256):
    """Pallas implementation of GRUNet.forward.

    inp:    (B, feature_dim)
    t, dt:  (B, 1)  -- present in the PyTorch signature but unused by forward
    hidden: (B, hidden_dim)
    params: dict with w_ih_t (F, 3H), w_hh_t (H, 3H), b_ih (3H,), b_hh (3H,)
    returns (B, hidden_dim)
    """
    del t, dt  # GRUNet.forward ignores t and dt

    B, F = inp.shape
    H = hidden.shape[1]

    w_ih_t = params["w_ih_t"]              # (F, 3H)
    w_hh_t = params["w_hh_t"]              # (H, 3H)
    b_ih = params["b_ih"].reshape(1, 3 * H)
    b_hh = params["b_hh"].reshape(1, 3 * H)

    # Batch tiling: a single full-extent tile for small B, otherwise fixed
    # tb_max-row tiles with zero-padding (pl.cdiv + padding -> no silent drop).
    if B <= tb_max:
        tb = B
        pad = 0
    else:
        tb = tb_max
        pad = (-B) % tb

    if pad:
        inp_p = jnp.pad(inp, ((0, pad), (0, 0)))
        hid_p = jnp.pad(hidden, ((0, pad), (0, 0)))
    else:
        inp_p, hid_p = inp, hidden
    Bp = B + pad

    out = pl.pallas_call(
        _gru_cell_kernel,
        out_shape=jax.ShapeDtypeStruct((Bp, H), inp.dtype),
        grid_spec=pl.GridSpec(
            grid=(pl.cdiv(Bp, tb),),
            in_specs=[
                pl.BlockSpec((tb, F), lambda i: (i, 0)),        # x tile
                pl.BlockSpec((tb, H), lambda i: (i, 0)),        # hidden tile
                pl.BlockSpec((F, 3 * H), lambda i: (0, 0)),     # W_ih^T (resident)
                pl.BlockSpec((H, 3 * H), lambda i: (0, 0)),     # W_hh^T (resident)
                pl.BlockSpec((1, 3 * H), lambda i: (0, 0)),     # b_ih
                pl.BlockSpec((1, 3 * H), lambda i: (0, 0)),     # b_hh
            ],
            out_specs=pl.BlockSpec((tb, H), lambda i: (i, 0)),
        ),
        compiler_params=pltpu.CompilerParams(
            dimension_semantics=("parallel",),
        ),
    )(inp_p, hid_p, w_ih_t, w_hh_t, b_ih, b_hh)

    return out[:B]


def init_params(key, hidden_dim, feature_dim, dtype=jnp.float32):
    """Matches GRUNet.__init__: weights ~ N(0, 0.1), biases = 0.

    PyTorch stores weight_ih as (3H, F) and weight_hh as (3H, H); we keep them
    pre-transposed so the kernel does plain x @ W (== x @ W_pt^T).
    """
    H3 = 3 * hidden_dim
    k1, k2 = jax.random.split(key)
    w_ih = (0.1 * jax.random.normal(k1, (H3, feature_dim))).astype(dtype)
    w_hh = (0.1 * jax.random.normal(k2, (H3, hidden_dim))).astype(dtype)
    return {
        "w_ih_t": w_ih.T,                         # (F, 3H)
        "w_hh_t": w_hh.T,                         # (H, 3H)
        "b_ih": jnp.zeros((H3,), dtype),
        "b_hh": jnp.zeros((H3,), dtype),
    }


def _gru_reference(inp, hidden, params):
    """Plain-JAX GRUCell reference (same math as torch.nn.GRUCell)."""
    H = hidden.shape[1]
    gi = inp @ params["w_ih_t"] + params["b_ih"]
    gh = hidden @ params["w_hh_t"] + params["b_hh"]
    r = jax.nn.sigmoid(gi[:, 0:H] + gh[:, 0:H])
    z = jax.nn.sigmoid(gi[:, H:2 * H] + gh[:, H:2 * H])
    n = jnp.tanh(gi[:, 2 * H:3 * H] + r * gh[:, 2 * H:3 * H])
    h_new = (1.0 - z) * n + z * hidden
    return h_new / 10.0


if __name__ == "__main__":
    hidden_dim = 32
    feature_dim = 30
    batch = 8

    key = jax.random.PRNGKey(0)
    kp, ki, kt, kd, kh = jax.random.split(key, 5)

    params = init_params(kp, hidden_dim, feature_dim)

    inp = jax.random.normal(ki, (batch, feature_dim), jnp.float32)
    t = jax.random.normal(kt, (batch, 1), jnp.float32)
    dt = jax.random.normal(kd, (batch, 1), jnp.float32)
    hidden = jax.random.normal(kh, (batch, hidden_dim), jnp.float32)

    out = gru_net_forward(inp, t, dt, hidden, params)
    out = jax.block_until_ready(out)

    ref = _gru_reference(inp, hidden, params)
    assert out.shape == (batch, hidden_dim)
    assert jnp.allclose(out, ref, atol=1e-5, rtol=1e-5)

    print("KERNEL_OK")
</pallas_src>

<mosaic_0001>
module attributes {stable_mosaic.version = 11 : i64} {
  func.func @_gru_cell_kernel(%arg0: i32, %arg1: memref<8x30xf32, #tpu.memory_space<vmem>>, %arg2: memref<8x32xf32, #tpu.memory_space<vmem>>, %arg3: memref<30x96xf32, #tpu.memory_space<vmem>>, %arg4: memref<32x96xf32, #tpu.memory_space<vmem>>, %arg5: memref<1x96xf32, #tpu.memory_space<vmem>>, %arg6: memref<1x96xf32, #tpu.memory_space<vmem>>, %arg7: memref<8x32xf32, #tpu.memory_space<vmem>>) attributes {dimension_semantics = [#tpu.dimension_semantics<parallel>], iteration_bounds = array<i64: 1>, scalar_prefetch = 0 : i64, scratch_operands = 0 : i64, tpu.core_type = #tpu.core_type<tc>, window_params = [{transform_indices = @transform_0, window_bounds = array<i64: 8, 30>}, {transform_indices = @transform_1, window_bounds = array<i64: 8, 32>}, {pipeline_mode = #tpu.pipeline_mode<synchronous>, transform_indices = @transform_2, window_bounds = array<i64: 30, 96>}, {pipeline_mode = #tpu.pipeline_mode<synchronous>, transform_indices = @transform_3, window_bounds = array<i64: 32, 96>}, {pipeline_mode = #tpu.pipeline_mode<synchronous>, transform_indices = @transform_4, window_bounds = array<i64: 1, 96>}, {pipeline_mode = #tpu.pipeline_mode<synchronous>, transform_indices = @transform_5, window_bounds = array<i64: 1, 96>}, {transform_indices = @transform_6, window_bounds = array<i64: 8, 32>}]} {
    %c0 = arith.constant 0 : index
    %c0_0 = arith.constant 0 : index
    %0 = vector.load %arg1[%c0, %c0_0] : memref<8x30xf32, #tpu.memory_space<vmem>>, vector<8x30xf32>
    %c0_1 = arith.constant 0 : index
    %c0_2 = arith.constant 0 : index
    %1 = vector.load %arg2[%c0_1, %c0_2] : memref<8x32xf32, #tpu.memory_space<vmem>>, vector<8x32xf32>
    %c0_3 = arith.constant 0 : index
    %c0_4 = arith.constant 0 : index
    %2 = vector.load %arg3[%c0_3, %c0_4] : memref<30x96xf32, #tpu.memory_space<vmem>>, vector<30x96xf32>
    %cst = arith.constant dense<0.000000e+00> : vector<8x96xf32>
    %3 = tpu.matmul %0, %2, %cst {dimension_numbers = #tpu.dot_dimension_numbers<[1], [0], [0], [1], [0, 0, 1, 1], [], []>} : vector<8x30xf32>, vector<30x96xf32>, vector<8x96xf32> -> vector<8x96xf32>
    %c0_5 = arith.constant 0 : index
    %c0_6 = arith.constant 0 : index
    %4 = vector.load %arg5[%c0_5, %c0_6] : memref<1x96xf32, #tpu.memory_space<vmem>>, vector<1x96xf32>
    %5 = vector.broadcast %4 : vector<1x96xf32> to vector<8x96xf32>
    %6 = arith.addf %3, %5 : vector<8x96xf32>
    %c0_7 = arith.constant 0 : index
    %c0_8 = arith.constant 0 : index
    %7 = vector.load %arg4[%c0_7, %c0_8] : memref<32x96xf32, #tpu.memory_space<vmem>>, vector<32x96xf32>
    %cst_9 = arith.constant dense<0.000000e+00> : vector<8x96xf32>
    %8 = tpu.matmul %1, %7, %cst_9 {dimension_numbers = #tpu.dot_dimension_numbers<[1], [0], [0], [1], [0, 0, 1, 1], [], []>} : vector<8x32xf32>, vector<32x96xf32>, vector<8x96xf32> -> vector<8x96xf32>
    %c0_10 = arith.constant 0 : index
    %c0_11 = arith.constant 0 : index
    %9 = vector.load %arg6[%c0_10, %c0_11] : memref<1x96xf32, #tpu.memory_space<vmem>>, vector<1x96xf32>
    %10 = vector.broadcast %9 : vector<1x96xf32> to vector<8x96xf32>
    %11 = arith.addf %8, %10 : vector<8x96xf32>
    %12 = vector.extract_strided_slice %6 {offsets = [0, 0], sizes = [8, 32], strides = [1, 1]} : vector<8x96xf32> to vector<8x32xf32>
    %13 = vector.extract_strided_slice %11 {offsets = [0, 0], sizes = [8, 32], strides = [1, 1]} : vector<8x96xf32> to vector<8x32xf32>
    %14 = arith.addf %12, %13 : vector<8x32xf32>
    %cst_12 = arith.constant 0.000000e+00 : f32
    %15 = vector.broadcast %cst_12 : f32 to vector<8x32xf32>
    %16 = arith.subf %15, %14 : vector<8x32xf32>
    %17 = math.exp %16 : vector<8x32xf32>
    %cst_13 = arith.constant 1.000000e+00 : f32
    %18 = vector.broadcast %cst_13 : f32 to vector<8x32xf32>
    %19 = arith.addf %18, %17 : vector<8x32xf32>
    %cst_14 = arith.constant 1.000000e+00 : f32
    %20 = vector.broadcast %cst_14 : f32 to vector<8x32xf32>
    %21 = arith.divf %20, %19 : vector<8x32xf32>
    %22 = vector.extract_strided_slice %6 {offsets = [0, 32], sizes = [8, 32], strides = [1, 1]} : vector<8x96xf32> to vector<8x32xf32>
    %23 = vector.extract_strided_slice %11 {offsets = [0, 32], sizes = [8, 32], strides = [1, 1]} : vector<8x96xf32> to vector<8x32xf32>
    %24 = arith.addf %22, %23 : vector<8x32xf32>
    %cst_15 = arith.constant 0.000000e+00 : f32
    %25 = vector.broadcast %cst_15 : f32 to vector<8x32xf32>
    %26 = arith.subf %25, %24 : vector<8x32xf32>
    %27 = math.exp %26 : vector<8x32xf32>
    %cst_16 = arith.constant 1.000000e+00 : f32
    %28 = vector.broadcast %cst_16 : f32 to vector<8x32xf32>
    %29 = arith.addf %28, %27 : vector<8x32xf32>
    %cst_17 = arith.constant 1.000000e+00 : f32
    %30 = vector.broadcast %cst_17 : f32 to vector<8x32xf32>
    %31 = arith.divf %30, %29 : vector<8x32xf32>
    %32 = vector.extract_strided_slice %6 {offsets = [0, 64], sizes = [8, 32], strides = [1, 1]} : vector<8x96xf32> to vector<8x32xf32>
    %33 = vector.extract_strided_slice %11 {offsets = [0, 64], sizes = [8, 32], strides = [1, 1]} : vector<8x96xf32> to vector<8x32xf32>
    %34 = arith.mulf %21, %33 : vector<8x32xf32>
    %35 = arith.addf %32, %34 : vector<8x32xf32>
    %36 = math.tanh %35 : vector<8x32xf32>
    %cst_18 = arith.constant 1.000000e+00 : f32
    %37 = vector.broadcast %cst_18 : f32 to vector<8x32xf32>
    %38 = arith.subf %37, %31 : vector<8x32xf32>
    %39 = arith.mulf %38, %36 : vector<8x32xf32>
    %40 = arith.mulf %31, %1 : vector<8x32xf32>
    %41 = arith.addf %39, %40 : vector<8x32xf32>
    %cst_19 = arith.constant 1.000000e+01 : f32
    %42 = vector.broadcast %cst_19 : f32 to vector<8x32xf32>
    %43 = arith.divf %41, %42 : vector<8x32xf32>
    %c0_20 = arith.constant 0 : index
    %c0_21 = arith.constant 0 : index
    %44 = vector.load %arg7[%c0_20, %c0_21] : memref<8x32xf32, #tpu.memory_space<vmem>>, vector<8x32xf32>
    tpu.vector_store %arg7[%c0_20, %c0_21], %43 {strides = array<i32>} : memref<8x32xf32, #tpu.memory_space<vmem>>, vector<8x32xf32>,
    return
  }
  func.func @transform_0(%arg0: i32) -> (i32, i32) {
    %c0_i32 = arith.constant 0 : i32
    %c0_i32_0 = arith.constant 0 : i32
    return %arg0, %c0_i32 : i32, i32
  }
  func.func @transform_1(%arg0: i32) -> (i32, i32) {
    %c0_i32 = arith.constant 0 : i32
    %c0_i32_0 = arith.constant 0 : i32
    return %arg0, %c0_i32 : i32, i32
  }
  func.func @transform_2(%arg0: i32) -> (i32, i32) {
    %c0_i32 = arith.constant 0 : i32
    %c0_i32_0 = arith.constant 0 : i32
    %c0_i32_1 = arith.constant 0 : i32
    return %c0_i32, %c0_i32_0 : i32, i32
  }
  func.func @transform_3(%arg0: i32) -> (i32, i32) {
    %c0_i32 = arith.constant 0 : i32
    %c0_i32_0 = arith.constant 0 : i32
    %c0_i32_1 = arith.constant 0 : i32
    return %c0_i32, %c0_i32_0 : i32, i32
  }
  func.func @transform_4(%arg0: i32) -> (i32, i32) {
    %c0_i32 = arith.constant 0 : i32
    %c0_i32_0 = arith.constant 0 : i32
    %c0_i32_1 = arith.constant 0 : i32
    return %c0_i32, %c0_i32_0 : i32, i32
  }
  func.func @transform_5(%arg0: i32) -> (i32, i32) {
    %c0_i32 = arith.constant 0 : i32
    %c0_i32_0 = arith.constant 0 : i32
    %c0_i32_1 = arith.constant 0 : i32
    return %c0_i32, %c0_i32_0 : i32, i32
  }
  func.func @transform_6(%arg0: i32) -> (i32, i32) {
    %c0_i32 = arith.constant 0 : i32
    %c0_i32_0 = arith.constant 0 : i32
    return %arg0, %c0_i32 : i32, i32
  }
}

</mosaic_0001>

<bundles_post_ra>
// kernel: tpu_custom_call.1
= control target key start
LH: loop header
LB: loop body
LE: loop exit
PB: predicated region body
PF: predicated region fallthrough
CT: control target
= control target key end

     0   :  { %11 = vsyncpa [#allocation3], 0  ;;  %s537_s0 = inlined_call_operand.hbm [shape: f32[8,30], index: 0, kind: input, shape index: {}]   ;;  %s538_s1 = inlined_call_operand.hbm [shape: f32[8,32], index: 1, kind: input, shape index: {}]   ;;  %s539_s2 = inlined_call_operand.hbm [shape: f32[30,96], index: 2, kind: input, shape index: {}]   ;;  %s540_s3 = inlined_call_operand.hbm [shape: f32[32,96], index: 3, kind: input, shape index: {}]   ;;  %s541_s4 = inlined_call_operand.vmem [shape: f32[1,96], index: 4, kind: input, shape index: {}]   ;;  %s542_s5 = inlined_call_operand.vmem [shape: f32[1,96], index: 5, kind: input, shape index: {}]   ;;  %s543_s6 = inlined_call_operand.hbm [shape: f32[8,32], index: 6, kind: output, shape index: {}]  }
   0x1   :  { %12 = vsyncpa [#allocation6], 0 }
   0x2   :  { %13 = vsyncpa [#allocation9], 0 }
   0x3   :  { %14 = vsyncpa [#allocation4], 0  ;;  %s467_s21 = smov [#allocation5]   ;;  %s468_s23 = smov [#allocation2]  }
   0x4   :  { %s31_s22 = sshll.u32 %s467_s21, 4  ;;  %s21_s24 = sshll.u32 %s468_s23, 4  ;;  %s32_s22 = int_to_ptr.vmem [resolvable:$true] %s31_s22  ;;  %s22_s24 = int_to_ptr.vmem [resolvable:$true] %s21_s24 }
   0x5   :  { %s367_s25 = scalar_lea.vmem %s32_s22, 128  ;;  %p372_p1 = scmp.lt.s32.totalorder %s32_s22, %s32_s22 }
   0x6   :  { %p368_p0 = scmp.ne.s32.totalorder %s32_s22, %s367_s25  ;;  %p373_p2 = scmp.lt.s32.totalorder %s367_s25, %s367_s25 }
   0x8   :  { %p374_p3 = por %p373_p2, %p372_p1 }
   0xa   :  { %p375_p4 = pnand %p374_p3, %p368_p0 }
   0xc   :  { %378 = shalt.err (!%p375_p4)
}
   0xd   :  { %34 = dma.hbm_to_vmem [thread:$0]  %s538_s1, 128, %s32_s22, [#allocation6]  }
   0xe   :  { %s387_s28 = scalar_lea.vmem %s22_s24, 128  ;;  %p392_p6 = scmp.lt.s32.totalorder %s22_s24, %s22_s24 }
   0xf   :  { %p388_p5 = scmp.ne.s32.totalorder %s22_s24, %s387_s28  ;;  %p393_p7 = scmp.lt.s32.totalorder %s387_s28, %s387_s28 }
  0x11   :  { %p394_p8 = por %p393_p7, %p392_p6 }
  0x13   :  { %p395_p9 = pnand %p394_p8, %p388_p5 }
  0x15   :  { %398 = shalt.err (!%p395_p9)
}
  0x16   :  { %24 = dma.hbm_to_vmem [thread:$0]  %s537_s0, 128, %s22_s24, [#allocation3]  }
  0x17   :  { %s469_s7 = smov [#allocation7]  }
  0x18   :  { %s40_s8 = sshll.u32 %s469_s7, 4  ;;  %s41_s8 = int_to_ptr.vmem [resolvable:$true] %s40_s8 }
  0x19   :  { %s407_s9 = scalar_lea.vmem %s41_s8, 512  ;;  %p412_p11 = scmp.lt.s32.totalorder %s41_s8, %s41_s8 }
  0x1a   :  { %p408_p10 = scmp.ne.s32.totalorder %s41_s8, %s407_s9  ;;  %p413_p12 = scmp.lt.s32.totalorder %s407_s9, %s407_s9 }
  0x1c   :  { %p414_p13 = por %p413_p12, %p412_p11 }
  0x1e   :  { %p415_p0 = pnand %p414_p13, %p408_p10 }
  0x20   :  { %418 = shalt.err (!%p415_p0)
}
  0x21   :  { %s470_s1 = smov 128   ;;  %s471_s10 = smov 8  }
  0x22   :  { %46 = dma.hbm_to_vmem [thread:$0]  %s539_s2, 512, %s41_s8, [#allocation6], %s470_s1, %s470_s1, %s471_s10  }
  0x23   :  { %s472_s13 = smov [#allocation8]  }
  0x24   :  { %s52_s14 = sshll.u32 %s472_s13, 4  ;;  %s53_s14 = int_to_ptr.vmem [resolvable:$true] %s52_s14 }
  0x25   :  { %s427_s0 = scalar_lea.vmem %s53_s14, 512  ;;  %p432_p2 = scmp.lt.s32.totalorder %s53_s14, %s53_s14 }
  0x26   :  { %p428_p1 = scmp.ne.s32.totalorder %s53_s14, %s427_s0  ;;  %p433_p3 = scmp.lt.s32.totalorder %s427_s0, %s427_s0 }
  0x28   :  { %p434_p4 = por %p433_p3, %p432_p2 }
  0x2a   :  { %p435_p5 = pnand %p434_p4, %p428_p1 }
  0x2c   :  { %438 = shalt.err (!%p435_p5)
}
  0x2d   :  { %58 = dma.hbm_to_vmem [thread:$0]  %s540_s3, 512, %s53_s14, [#allocation9], %s470_s1, %s470_s1, %s471_s10  }
  0x2e   :  { %459 = dma.done.wait [#allocation3], 128  }
  0x2f   :  { %460 = vsyncadd [#allocation3], 4294967168 }
  0x30   :  { %461 = dma.done.wait [#allocation6], 640  }
  0x31   :  { %462 = vsyncadd [#allocation6], 4294966656 }
  0x32   :  { %463 = dma.done.wait [#allocation9], 512  }
  0x33   :  { %464 = vsyncadd [#allocation9], 4294966784  ;;  %v473_v0 = vmov 0.0   ;;  %vm474_vm0 = vmmov 0   ;;  %vm92_vm1 = vcmask 1045504   ;;  %v169_v2 = vld [vmem:[#allocation8 + $0x18] sm:$0xff] }
  0x34   :  { %319 = vmatprep.subr.mxu0 %v473_v0  ;;  %330 = vmatprep.subr.mxu1 %v473_v0  ;;  %v80_v1 = vld [vmem:[#allocation7 + $0x18] sm:$0x3f]  ;;  %v79_v3 = vld [vmem:[#allocation7 + $0x10] sm:$0xff]  ;;  %v78_v5 = vld [vmem:[#allocation7 + $0x8] sm:$0xff]  ;;  %vm88_vm2 = vcmask 244736   ;;  %vm177_vm3 = vcmask 261120  }
  0x35   :  { %327 = vmatprep.mubr.msk.f32.mxu0 %vm474_vm0, %v473_v0  ;;  %338 = vmatprep.mubr.msk.f32.mxu1 %vm474_vm0, %v473_v0  ;;  %v168_v4 = vld [vmem:[#allocation8 + $0x10] sm:$0xff]  ;;  %v167_v6 = vld [vmem:[#allocation8 + $0x8] sm:$0xff]  ;;  %v77_v7 = vld [vmem:[#allocation7] sm:$0xff]  ;;  %s475_s17 = smov 64   ;;  %s477_s20 = smov 32  }
  0x36   :  { %320 = vmatpush3.msk.msra.mxu0 %vm92_vm1, %v80_v1  ;;  %331 = vmatpush3.msra.mxu1 %v169_v2  ;;  %v166_v8 = vld [vmem:[#allocation8] sm:$0xff]  ;;  %v75_v9 = vld [vmem:[#allocation2] sm:$0xff]  ;;  %v76_v10 = vld [vmem:[#allocation5] sm:$0xff] }
  0x37   :  { %321 = vmatprep.subr.mxu0 %v473_v0  ;;  %332 = vmatprep.subr.mxu1 %v473_v0  ;;  %v307_v11 = vld [vmem:[%s542_s5] ss:$0 sm:$0xff]  ;;  %s476_s5 = smov 96  }
  0x38   :  { %322 = vmatpush3.msra.mxu0 %v79_v3  ;;  %333 = vmatpush3.msra.mxu1 %v168_v4  ;;  %v304_v17 = vld [vmem:[%s541_s4] ss:$0 sm:$0xff]  ;;  %s478_s4 = smov [#allocation10]  }
  0x39   :  { %323 = vmatprep.subr.mxu0 %v473_v0  ;;  %334 = vmatprep.subr.mxu1 %v473_v0  ;;  %s293_s21 = sshll.u32 %s478_s4, 4  ;;  %s294_s21 = int_to_ptr.vmem [resolvable:$true] %s293_s21 }
  0x3a   :  { %324 = vmatpush3.msra.mxu0 %v78_v5  ;;  %335 = vmatpush3.msra.mxu1 %v167_v6  ;;  %s439_s22 = scalar_lea.vmem %s294_s21, 128  ;;  %p444_p7 = scmp.lt.s32.totalorder %s294_s21, %s294_s21 }
  0x3b   :  { %325 = vmatprep.subr.mxu0 %v473_v0  ;;  %336 = vmatprep.subr.mxu1 %v473_v0  ;;  %p440_p6 = scmp.ne.s32.totalorder %s294_s21, %s439_s22  ;;  %p445_p8 = scmp.lt.s32.totalorder %s439_s22, %s439_s22 }
  0x3c   :  { %326 = vmatpush3.msra.mxu0 %v77_v7  ;;  %337 = vmatpush3.msra.mxu1 %v166_v8 }
  0x3d   :  { %328 = vmatmul.mubr.msk.f32.vlgmr.msra.gmra.mxu0 %vm88_vm2, %v75_v9  ;;  %339 = vmatmul.mubr.msk.f32.vlgmr.msra.gmra.mxu1 %vm177_vm3, %v76_v10  ;;  %p446_p9 = por %p445_p8, %p444_p7 }
  0x3f   :  { %p447_p10 = pnand %p446_p9, %p440_p6 }
  0xfd   :  { %v162_v12 = vpop.f32.mrf.mxu0  ;;  %v247_v13 = vpop.f32.mrf.mxu1 }
  0xfe   :  { %v248_v14 = vadd.f32 %v307_v11, %v247_v13  ;;  %v163_v18 = vadd.f32 %v304_v17, %v162_v12 }
  0xff   :  { %v340_v15 = vpop.f32.mrf.mxu1  ;;  %v329_v16 = vpop.f32.mrf.mxu0 }
 0x100   :  { %259 = vrot.lane.b32.xlu0 %v248_v14, %s475_s17  ;;  %v251_v19 = vadd.f32 %v248_v14, %v163_v18 }
 0x102   :  { %v252_v20 = vsub.f32 0.0, %v251_v19 }
 0x104   :  { %v253_v21 = vmul.f32 1.442695, %v252_v20 }
 0x106   :  { %353 = vpow2.f32 %v253_v21 }
 0x113   :  { %v354_v22 = vpop.eup %353 }
 0x114   :  { %v255_v23 = vadd.f32 1.0, %v354_v22 }
 0x116   :  { %355 = vrcp.f32 %v255_v23 }
 0x123   :  { %v356_v24 = vpop.eup %355 }
 0x124   :  { %v269_v31 = vsub.f32 1.0, %v356_v24 }
 0x172   :  { %v260_v25 = vpop.permute.xlu0 %259 }
 0x173   :  { %v262_v26 = vmul.f32 %v356_v24, %v260_v25 }
 0x175   :  { %264 = vrot.lane.b32.xlu0 %v262_v26, %s475_s17 }
 0x1e7   :  { %v265_v27 = vpop.permute.xlu0 %264 }
 0x1e8   :  { %v267_v28 = vadd.f32 %v265_v27, %v163_v18 }
 0x1ea   :  { %357 = vtanh.f32 %v267_v28 }
 0x1f7   :  { %v358_v29 = vpop.eup %357 }
 0x1f8   :  { %271 = vrot.lane.b32.xlu1 %v358_v29, %s476_s5 }
 0x1fc   :  { %275 = vrot.lane.b32.xlu1 %v76_v10, %s477_s20 }
 0x26a   :  { %v272_v30 = vpop.permute.xlu1 %271 }
 0x26b   :  { %v274_v33 = vmul.f32 %v272_v30, %v269_v31 }
 0x26e   :  { %v276_v32 = vpop.permute.xlu1 %275 }
 0x26f   :  { %v278_v34 = vmul.f32 %v356_v24, %v276_v32 }
 0x271   :  { %v279_v35 = vadd.f32 %v278_v34, %v274_v33 }
 0x273   :  { %v281_v36 = vmul.f32 0.1, %v279_v35 }
 0x275   :  { %283 = vrot.lane.b32.xlu0 %v281_v36, %s476_s5 }
 0x2e7   :  { %v284_v37 = vpop.permute.xlu0 %283 }
 0x2e8   :  { %286 = vst.msk [vmem:[#allocation10] sm:$0xff] %vm177_vm3, %v284_v37 }
 0x2e9   :  { %450 = shalt.err (!%p447_p10)
}
 0x2ea   :  { %296 = dma.vmem_to_hbm [thread:$0]  %s294_s21, 128, %s543_s6, [#allocation4]  }
 0x2eb   :  { %465 = dma.done.wait [#allocation4], 128  }
 0x2ec   :  { %466 = vsyncadd [#allocation4], 4294967168 }
 0x2ed   :  { %300 = vsyncpa [#allocation3], 1 }
 0x2ee   :  { %301 = vsyncpa [#allocation6], 1 }
 0x2ef   :  { %302 = vsyncpa [#allocation9], 1 }
 0x2f0   :  { %303 = vsyncpa [#allocation4], 1 }

</bundles_post_ra>
